<compile_context>
chip_gen: v6e
topology: v6e:2x2x1
jax: 0.10.0
libtpu: 0.0.40
codegen_flags: <defaults>
</compile_context>

<pallas_src>
import functools
import math

import jax
import jax.numpy as jnp
from jax.experimental import pallas as pl
from jax.experimental.pallas import tpu as pltpu


def _attn_kernel(x_ref, mask_ref, o_ref, *, num_heads, head_dim, scale):
    """One batch element per grid step; all heads computed in-kernel.

    x_ref:    (1, S, H)     activations (Q = K = V by construction)
    mask_ref: (1, 1, 1, S)  additive key mask for this batch element
    o_ref:    (1, S, H)     context output, lane-dense in H
    """
    x = x_ref[0]            # (S, H)
    m = mask_ref[0, 0]      # (1, S) -> broadcasts over the S query rows

    ctxs = []
    for h in range(num_heads):                      # static unroll over heads
        sl = slice(h * head_dim, (h + 1) * head_dim)
        kv = x[:, sl]                               # K = V = same slice of x
        q = kv * scale                              # fold 1/sqrt(hd) into Q
        # (S, S) logits on the MXU, fp32 accumulate; contract last dims of both
        # operands directly (no in-kernel transpose of K).
        s = jax.lax.dot_general(q, kv, (((1,), (1,)), ((), ())),
                                preferred_element_type=jnp.float32)
        s = s + m
        s = s - jnp.max(s, axis=-1, keepdims=True)  # stable softmax
        p = jnp.exp(s)
        denom = jnp.sum(p, axis=-1, keepdims=True)  # (S, 1)
        # Un-normalized PV matmul, then normalize the (S, hd) context instead
        # of the (S, S) probs; reciprocal runs on the EUP (separate VLIW slot).
        ctx = jnp.dot(p.astype(kv.dtype), kv, preferred_element_type=jnp.float32)
        ctx = ctx * pl.reciprocal(denom, approx=True)
        # TODO(synk): training-mode dropout on the probs (is_eval=False) would
        # need pltpu.prng_seed / prng_random_bits; eval mode implemented here.
        ctxs.append(ctx)

    # Single lane-dense store of the full (S, H) context tile.
    o_ref[0] = jnp.concatenate(ctxs, axis=-1).astype(o_ref.dtype)


def bert_self_attention(hidden_states, attention_mask, num_heads):
    """hidden_states: (S, B, H); attention_mask broadcastable from (B, 1, 1, S).

    Returns context_layer of shape (S, B, H), matching the PyTorch module.
    """
    S, B, H = hidden_states.shape
    assert H % num_heads == 0
    hd = H // num_heads
    scale = 1.0 / math.sqrt(hd)

    # Q = K = V = hidden_states (the reference forward discards the Linear
    # projections). One batch-major transpose in, one out; the kernel itself
    # only ever moves lane-dense (1, S, H) tiles and a (1, 1, 1, S) mask row.
    x = hidden_states.transpose(1, 0, 2)                              # (B, S, H)
    # Standard BERT additive padding-mask layout: same key mask for every query
    # row and head. TODO(synk): per-head / per-query masks would need the full
    # (B, nh, S, S) path.
    mask = jnp.broadcast_to(attention_mask, (B, 1, 1, S)).astype(jnp.float32)

    kernel = functools.partial(_attn_kernel, num_heads=num_heads,
                               head_dim=hd, scale=scale)

    out = pl.pallas_call(
        kernel,
        out_shape=jax.ShapeDtypeStruct((B, S, H), hidden_states.dtype),
        grid_spec=pltpu.PrefetchScalarGridSpec(
            num_scalar_prefetch=0,
            grid=(B,),
            in_specs=[
                pl.BlockSpec((1, S, H), lambda b: (b, 0, 0)),        # Q=K=V
                pl.BlockSpec((1, 1, 1, S), lambda b: (b, 0, 0, 0)),  # key mask
            ],
            out_specs=pl.BlockSpec((1, S, H), lambda b: (b, 0, 0)),
        ),
        compiler_params=pltpu.CompilerParams(
            dimension_semantics=("parallel",)),
        # Default scoped VMEM is ample at these block sizes (one (S, H) tile,
        # one (S, S) transient per head). TODO(synk): for long sequences
        # (S >= 2048, esp. v7x 64 MiB VMEM) add a KV grid axis with a
        # flash-style online-softmax accumulator and raise vmem_limit_bytes.
    )(x, mask)

    return out.transpose(1, 0, 2)   # (B, S, H) -> (S, B, H)


def _reference(hidden_states, attention_mask, num_heads):
    """Pure-JAX re-implementation of the PyTorch forward for verification."""
    S, B, H = hidden_states.shape
    hd = H // num_heads
    q = hidden_states.reshape(S, B * num_heads, hd).transpose(1, 0, 2)   # (B*nh, S, hd)
    k = hidden_states.reshape(S, B * num_heads, hd).transpose(1, 2, 0)   # (B*nh, hd, S)
    v = hidden_states.reshape(S, B * num_heads, hd).transpose(1, 0, 2)   # (B*nh, S, hd)
    scores = jnp.einsum("bqd,bdk->bqk", q, k).reshape(B, num_heads, S, S)
    scores = scores / math.sqrt(hd) + attention_mask
    probs = jax.nn.softmax(scores, axis=-1).reshape(B * num_heads, S, S)
    ctx = jnp.einsum("bqk,bkd->bqd", probs, v)                           # (B*nh, S, hd)
    return ctx.transpose(1, 0, 2).reshape(S, B, H)


if __name__ == "__main__":
    S, B, H, NH = 8, 2, 32, 4
    key = jax.random.PRNGKey(0)
    k_hs, k_mask = jax.random.split(key, 2)

    hidden_states = jax.random.normal(k_hs, (S, B, H), dtype=jnp.float32)
    # additive attention mask, broadcast as (B, 1, 1, S): 0 = keep, -10000 = masked
    keep = jax.random.bernoulli(k_mask, p=0.8, shape=(B, 1, 1, S))
    attention_mask = jnp.where(keep, 0.0, -10000.0).astype(jnp.float32)

    # NOTE: the module's q/k/v Linear parameters are intentionally NOT created:
    # the reference forward overwrites their outputs with hidden_states, so
    # they are dead parameters that never affect the result.

    out = bert_self_attention(hidden_states, attention_mask, NH)
    out = jax.block_until_ready(out)

    ref = _reference(hidden_states, attention_mask, NH)
    assert out.shape == (S, B, H)
    # Tolerance relaxed vs. exact fp32 because the kernel uses the EUP's
    # approximate reciprocal for the softmax normalization.
    assert jnp.allclose(out, ref, atol=1e-2, rtol=1e-2), "mismatch vs reference"

    print("KERNEL_OK")
</pallas_src>

<mosaic_0001>
module attributes {stable_mosaic.version = 11 : i64} {
  func.func @_attn_kernel(%arg0: i32, %arg1: memref<1x8x32xf32, #tpu.memory_space<vmem>>, %arg2: memref<1x1x1x8xf32, #tpu.memory_space<vmem>>, %arg3: memref<1x8x32xf32, #tpu.memory_space<vmem>>) attributes {dimension_semantics = [#tpu.dimension_semantics<parallel>], iteration_bounds = array<i64: 2>, scalar_prefetch = 0 : i64, scratch_operands = 0 : i64, tpu.core_type = #tpu.core_type<tc>, window_params = [{transform_indices = @transform_0, window_bounds = array<i64: 1, 8, 32>}, {transform_indices = @transform_1, window_bounds = array<i64: 1, 1, 1, 8>}, {transform_indices = @transform_2, window_bounds = array<i64: 1, 8, 32>}]} {
    %c0 = arith.constant 0 : index
    %c0_0 = arith.constant 0 : index
    %c0_1 = arith.constant 0 : index
    %0 = vector.load %arg1[%c0, %c0_0, %c0_1] : memref<1x8x32xf32, #tpu.memory_space<vmem>>, vector<1x8x32xf32>
    %1 = vector.shape_cast %0 : vector<1x8x32xf32> to vector<8x32xf32>
    %c0_2 = arith.constant 0 : index
    %c0_3 = arith.constant 0 : index
    %c0_4 = arith.constant 0 : index
    %c0_5 = arith.constant 0 : index
    %2 = vector.load %arg2[%c0_2, %c0_3, %c0_4, %c0_5] : memref<1x1x1x8xf32, #tpu.memory_space<vmem>>, vector<1x1x1x8xf32>
    %3 = vector.shape_cast %2 : vector<1x1x1x8xf32> to vector<1x8xf32>
    %4 = vector.extract_strided_slice %1 {offsets = [0, 0], sizes = [8, 8], strides = [1, 1]} : vector<8x32xf32> to vector<8x8xf32>
    %cst = arith.constant 0.353553385 : f32
    %5 = vector.broadcast %cst : f32 to vector<8x8xf32>
    %6 = arith.mulf %4, %5 : vector<8x8xf32>
    %cst_6 = arith.constant dense<0.000000e+00> : vector<8x8xf32>
    %7 = tpu.matmul %6, %4, %cst_6 {dimension_numbers = #tpu.dot_dimension_numbers<[1], [1], [0], [0], [0, 0, 1, 0], [], []>} : vector<8x8xf32>, vector<8x8xf32>, vector<8x8xf32> -> vector<8x8xf32>
    %8 = vector.broadcast %3 : vector<1x8xf32> to vector<8x8xf32>
    %9 = arith.addf %7, %8 : vector<8x8xf32>
    %cst_7 = arith.constant dense<0xFF800000> : vector<8xf32>
    %10 = vector.multi_reduction <maximumf>, %9, %cst_7 [1] : vector<8x8xf32> to vector<8xf32>
    %11 = vector.shape_cast %10 : vector<8xf32> to vector<8x1xf32>
    %12 = vector.broadcast %11 : vector<8x1xf32> to vector<8x8xf32>
    %13 = arith.subf %9, %12 : vector<8x8xf32>
    %14 = math.exp %13 : vector<8x8xf32>
    %cst_8 = arith.constant dense<0.000000e+00> : vector<8xf32>
    %15 = vector.multi_reduction <add>, %14, %cst_8 [1] : vector<8x8xf32> to vector<8xf32>
    %16 = vector.shape_cast %15 : vector<8xf32> to vector<8x1xf32>
    %cst_9 = arith.constant dense<0.000000e+00> : vector<8x8xf32>
    %17 = tpu.matmul %14, %4, %cst_9 {dimension_numbers = #tpu.dot_dimension_numbers<[1], [0], [0], [1], [0, 0, 1, 1], [], []>} : vector<8x8xf32>, vector<8x8xf32>, vector<8x8xf32> -> vector<8x8xf32>
    %18 = tpu.reciprocal %16 {approx = true} : vector<8x1xf32> -> vector<8x1xf32>
    %19 = vector.broadcast %18 : vector<8x1xf32> to vector<8x8xf32>
    %20 = arith.mulf %17, %19 : vector<8x8xf32>
    %21 = vector.extract_strided_slice %1 {offsets = [0, 8], sizes = [8, 8], strides = [1, 1]} : vector<8x32xf32> to vector<8x8xf32>
    %cst_10 = arith.constant 0.353553385 : f32
    %22 = vector.broadcast %cst_10 : f32 to vector<8x8xf32>
    %23 = arith.mulf %21, %22 : vector<8x8xf32>
    %cst_11 = arith.constant dense<0.000000e+00> : vector<8x8xf32>
    %24 = tpu.matmul %23, %21, %cst_11 {dimension_numbers = #tpu.dot_dimension_numbers<[1], [1], [0], [0], [0, 0, 1, 0], [], []>} : vector<8x8xf32>, vector<8x8xf32>, vector<8x8xf32> -> vector<8x8xf32>
    %25 = vector.broadcast %3 : vector<1x8xf32> to vector<8x8xf32>
    %26 = arith.addf %24, %25 : vector<8x8xf32>
    %cst_12 = arith.constant dense<0xFF800000> : vector<8xf32>
    %27 = vector.multi_reduction <maximumf>, %26, %cst_12 [1] : vector<8x8xf32> to vector<8xf32>
    %28 = vector.shape_cast %27 : vector<8xf32> to vector<8x1xf32>
    %29 = vector.broadcast %28 : vector<8x1xf32> to vector<8x8xf32>
    %30 = arith.subf %26, %29 : vector<8x8xf32>
    %31 = math.exp %30 : vector<8x8xf32>
    %cst_13 = arith.constant dense<0.000000e+00> : vector<8xf32>
    %32 = vector.multi_reduction <add>, %31, %cst_13 [1] : vector<8x8xf32> to vector<8xf32>
    %33 = vector.shape_cast %32 : vector<8xf32> to vector<8x1xf32>
    %cst_14 = arith.constant dense<0.000000e+00> : vector<8x8xf32>
    %34 = tpu.matmul %31, %21, %cst_14 {dimension_numbers = #tpu.dot_dimension_numbers<[1], [0], [0], [1], [0, 0, 1, 1], [], []>} : vector<8x8xf32>, vector<8x8xf32>, vector<8x8xf32> -> vector<8x8xf32>
    %35 = tpu.reciprocal %33 {approx = true} : vector<8x1xf32> -> vector<8x1xf32>
    %36 = vector.broadcast %35 : vector<8x1xf32> to vector<8x8xf32>
    %37 = arith.mulf %34, %36 : vector<8x8xf32>
    %38 = vector.extract_strided_slice %1 {offsets = [0, 16], sizes = [8, 8], strides = [1, 1]} : vector<8x32xf32> to vector<8x8xf32>
    %cst_15 = arith.constant 0.353553385 : f32
    %39 = vector.broadcast %cst_15 : f32 to vector<8x8xf32>
    %40 = arith.mulf %38, %39 : vector<8x8xf32>
    %cst_16 = arith.constant dense<0.000000e+00> : vector<8x8xf32>
    %41 = tpu.matmul %40, %38, %cst_16 {dimension_numbers = #tpu.dot_dimension_numbers<[1], [1], [0], [0], [0, 0, 1, 0], [], []>} : vector<8x8xf32>, vector<8x8xf32>, vector<8x8xf32> -> vector<8x8xf32>
    %42 = vector.broadcast %3 : vector<1x8xf32> to vector<8x8xf32>
    %43 = arith.addf %41, %42 : vector<8x8xf32>
    %cst_17 = arith.constant dense<0xFF800000> : vector<8xf32>
    %44 = vector.multi_reduction <maximumf>, %43, %cst_17 [1] : vector<8x8xf32> to vector<8xf32>
    %45 = vector.shape_cast %44 : vector<8xf32> to vector<8x1xf32>
    %46 = vector.broadcast %45 : vector<8x1xf32> to vector<8x8xf32>
    %47 = arith.subf %43, %46 : vector<8x8xf32>
    %48 = math.exp %47 : vector<8x8xf32>
    %cst_18 = arith.constant dense<0.000000e+00> : vector<8xf32>
    %49 = vector.multi_reduction <add>, %48, %cst_18 [1] : vector<8x8xf32> to vector<8xf32>
    %50 = vector.shape_cast %49 : vector<8xf32> to vector<8x1xf32>
    %cst_19 = arith.constant dense<0.000000e+00> : vector<8x8xf32>
    %51 = tpu.matmul %48, %38, %cst_19 {dimension_numbers = #tpu.dot_dimension_numbers<[1], [0], [0], [1], [0, 0, 1, 1], [], []>} : vector<8x8xf32>, vector<8x8xf32>, vector<8x8xf32> -> vector<8x8xf32>
    %52 = tpu.reciprocal %50 {approx = true} : vector<8x1xf32> -> vector<8x1xf32>
    %53 = vector.broadcast %52 : vector<8x1xf32> to vector<8x8xf32>
    %54 = arith.mulf %51, %53 : vector<8x8xf32>
    %55 = vector.extract_strided_slice %1 {offsets = [0, 24], sizes = [8, 8], strides = [1, 1]} : vector<8x32xf32> to vector<8x8xf32>
    %cst_20 = arith.constant 0.353553385 : f32
    %56 = vector.broadcast %cst_20 : f32 to vector<8x8xf32>
    %57 = arith.mulf %55, %56 : vector<8x8xf32>
    %cst_21 = arith.constant dense<0.000000e+00> : vector<8x8xf32>
    %58 = tpu.matmul %57, %55, %cst_21 {dimension_numbers = #tpu.dot_dimension_numbers<[1], [1], [0], [0], [0, 0, 1, 0], [], []>} : vector<8x8xf32>, vector<8x8xf32>, vector<8x8xf32> -> vector<8x8xf32>
    %59 = vector.broadcast %3 : vector<1x8xf32> to vector<8x8xf32>
    %60 = arith.addf %58, %59 : vector<8x8xf32>
    %cst_22 = arith.constant dense<0xFF800000> : vector<8xf32>
    %61 = vector.multi_reduction <maximumf>, %60, %cst_22 [1] : vector<8x8xf32> to vector<8xf32>
    %62 = vector.shape_cast %61 : vector<8xf32> to vector<8x1xf32>
    %63 = vector.broadcast %62 : vector<8x1xf32> to vector<8x8xf32>
    %64 = arith.subf %60, %63 : vector<8x8xf32>
    %65 = math.exp %64 : vector<8x8xf32>
    %cst_23 = arith.constant dense<0.000000e+00> : vector<8xf32>
    %66 = vector.multi_reduction <add>, %65, %cst_23 [1] : vector<8x8xf32> to vector<8xf32>
    %67 = vector.shape_cast %66 : vector<8xf32> to vector<8x1xf32>
    %cst_24 = arith.constant dense<0.000000e+00> : vector<8x8xf32>
    %68 = tpu.matmul %65, %55, %cst_24 {dimension_numbers = #tpu.dot_dimension_numbers<[1], [0], [0], [1], [0, 0, 1, 1], [], []>} : vector<8x8xf32>, vector<8x8xf32>, vector<8x8xf32> -> vector<8x8xf32>
    %69 = tpu.reciprocal %67 {approx = true} : vector<8x1xf32> -> vector<8x1xf32>
    %70 = vector.broadcast %69 : vector<8x1xf32> to vector<8x8xf32>
    %71 = arith.mulf %68, %70 : vector<8x8xf32>
    %72 = tpu.concatenate %20, %37, %54, %71 in 1 : vector<8x8xf32>, vector<8x8xf32>, vector<8x8xf32>, vector<8x8xf32> -> vector<8x32xf32>
    %c0_25 = arith.constant 0 : index
    %c0_26 = arith.constant 0 : index
    %c0_27 = arith.constant 0 : index
    %73 = vector.load %arg3[%c0_25, %c0_26, %c0_27] : memref<1x8x32xf32, #tpu.memory_space<vmem>>, vector<1x8x32xf32>
    %74 = vector.shape_cast %73 : vector<1x8x32xf32> to vector<8x32xf32>
    %75 = vector.shape_cast %72 : vector<8x32xf32> to vector<1x8x32xf32>
    tpu.vector_store %arg3[%c0_25, %c0_26, %c0_27], %75 {strides = array<i32>} : memref<1x8x32xf32, #tpu.memory_space<vmem>>, vector<1x8x32xf32>,
    return
  }
  func.func @transform_0(%arg0: i32) -> (i32, i32, i32) {
    %c0_i32 = arith.constant 0 : i32
    %c0_i32_0 = arith.constant 0 : i32
    %c0_i32_1 = arith.constant 0 : i32
    return %arg0, %c0_i32, %c0_i32_0 : i32, i32, i32
  }
  func.func @transform_1(%arg0: i32) -> (i32, i32, i32, i32) {
    %c0_i32 = arith.constant 0 : i32
    %c0_i32_0 = arith.constant 0 : i32
    %c0_i32_1 = arith.constant 0 : i32
    %c0_i32_2 = arith.constant 0 : i32
    return %arg0, %c0_i32, %c0_i32_0, %c0_i32_1 : i32, i32, i32, i32
  }
  func.func @transform_2(%arg0: i32) -> (i32, i32, i32) {
    %c0_i32 = arith.constant 0 : i32
    %c0_i32_0 = arith.constant 0 : i32
    %c0_i32_1 = arith.constant 0 : i32
    return %arg0, %c0_i32, %c0_i32_0 : i32, i32, i32
  }
}

</mosaic_0001>

<bundles_post_ra>
// kernel: tpu_custom_call.1
= control target key start
LH: loop header
LB: loop body
LE: loop exit
PB: predicated region body
PF: predicated region fallthrough
CT: control target
= control target key end

     0   :  { %7 = vsyncpa [#allocation3], 0  ;;  %s1531_s0 = inlined_call_operand.hbm [shape: f32[2,8,32], index: 0, kind: input, shape index: {}]   ;;  %s1532_s1 = inlined_call_operand.hbm [shape: f32[2,1,1,8], index: 1, kind: input, shape index: {}]   ;;  %s1533_s2 = inlined_call_operand.hbm [shape: f32[2,8,32], index: 2, kind: output, shape index: {}]  }
   0x1   :  { %9 = vsyncpa [#allocation3 + $0x1], 0 }
   0x2   :  { %10 = vsyncpa [#allocation6], 0 }
   0x3   :  { %12 = vsyncpa [#allocation6 + $0x1], 0 }
   0x4   :  { %13 = vsyncpa [#allocation4], 0 }
   0x5   :  { %15 = vsyncpa [#allocation4 + $0x1], 0  ;;  %s1284_s9 = smov 0   ;;  %s1286_s10 = smov 0  }
   0x6   :  { %s1288_s11 = smov 0   ;;  %s1290_s12 = smov 0  }
   0x7 LB: > { %s1305_s13 = sadd.s32 4294967295, %s1256_s12   ;;  %s975_s14 = sadd.s32 4294967294, %s1256_s12   ;;  %s1256_s12 = sphi %s1290_s12, %s1552_s12   ;;  %s1252_s11 = sphi %s1288_s11, %s1551_s11   ;;  %s1248_s10 = sphi %s1286_s10, %s1550_s10   ;;  %s1244_s9 = sphi %s1284_s9, %s1549_s9  }
   0x8   : > { %s1309_s15 = sadd.s32 1, %s1256_s12   ;;  %s28_s16 = sadd.s32 1, %s1252_s11 }
   0x9   : > { %s25_s17 = ssub.s32 %s1256_s12, %s1309_s15  ;;  %p35_p0 = scmp.ne.s32.totalorder %s1252_s11, %s1248_s10 }
   0xa   : > { %p26_p1 = scmp.eq.s32.totalorder %s25_s17, 0  ;;  %p36_p2 = scmp.eq.s32.totalorder %s1256_s12, 0 }
   0xb   : > { %p41_p3 = scmp.ne.s32.totalorder %s1248_s10, %s1244_s9  ;;  %p42_p4 = scmp.eq.s32.totalorder %s1305_s13, 0 }
   0xc   : > { %s1321_s18 = scalar_select %p26_p1, %s1252_s11, %s28_s16  }
   0xd   : > { %p1323_p5 = por %p36_p2, %p35_p0  ;;  %p1327_p6 = por %p42_p4, %p41_p3 }
   0xe   : > { %p91_p7 = scmp.eq.s32.totalorder %s1305_s13, 1  ;;  %p97_p8 = scmp.eq.s32.totalorder %s975_s14, 1 }
   0xf   : > { %s1537_s20 = scalar_select %p1327_p6, 1, 0 }
  0x10   : > { %p1074_p10 = scmp.lt.s32.totalorder %s1256_s12, 2  ;;  %p1334_p11 = por %p91_p7, %p35_p0 }
  0x11   : > { %p1338_p12 = por %p97_p8, %p41_p3  ;;  %s1343_s23 = sand.u32 1, %s1252_s11  }
  0x12   : > { %s1538_s21 = scalar_select %p1334_p11, 1, 0 }
  0x13   : > { %s1539_s22 = scalar_select %p1338_p12, 1, 0 }
  0x14   : > { %s979_s24 = sshll.u32 %s1256_s12, 7  ;;  %s978_s25 = sshll.u32 %s1343_s23, 3 }
  0x15   : > { %s1350_s28 = scalar_lea.hbm %s1531_s0, %s979_s24  ;;  %s121_s29 = scalar_lea.vmem [#allocation2], %s978_s25 }
  0x16   : > { %s128_s30 = sshll.u32 %s121_s29, 4  ;;  %p1354_p13 = pnand %p1074_p10, %p1323_p5  ;;  %s1358_s30 = int_to_ptr.vmem [resolvable:$true] %s128_s30 }
  0x17   : > { %s118_s4 = scalar_lea.sflag [#allocation3], %s1343_s23  ;;  %s1132_s5 = scalar_lea.hbm %s1350_s28, 128 }
  0x18   : > { %p1133_p2 = scmp.ne.s32.totalorder %s1350_s28, %s1132_s5  ;;  %p1134_p3 = pneg %p1354_p13 }
  0x19   : > { %s1137_s8 = scalar_lea.hbm %s1531_s0, 256  ;;  %p1138_p5 = scmp.lt.s32.totalorder %s1350_s28, %s1531_s0 }
  0x1a   : > { %p1135_p4 = pnand %p1134_p3, %p1133_p2  ;;  %p1139_p8 = scmp.lt.s32.totalorder %s1137_s8, %s1132_s5 }
  0x1c   : > { %p1136_p7 = pneg %p1135_p4  ;;  %p1140_p10 = por %p1139_p8, %p1138_p5 }
  0x1e   : > { %p1141_p9 = pnand %p1140_p10, %p1136_p7 }
  0x20   : > { %1144 = shalt.err (!%p1141_p9)
}
  0x21   : > { %s1145_s17 = scalar_lea.vmem %s1358_s30, 128  ;;  %s1258_s19 = smov [#allocation2]  }
  0x22   : > { %p1146_p0 = scmp.ne.s32.totalorder %s1358_s30, %s1145_s17  ;;  %s1150_s24 = sshll.u32 %s1258_s19, 4  ;;  %s1151_s24 = int_to_ptr.vmem [resolvable:$false] %s1150_s24 }
  0x23   : > { %s1152_s25 = scalar_lea.vmem %s1151_s24, 256  ;;  %p1153_p1 = scmp.lt.s32.totalorder %s1358_s30, %s1151_s24 }
  0x24   : > { %p1148_p2 = pnand %p1146_p0, %p1134_p3  ;;  %p1154_p12 = scmp.lt.s32.totalorder %s1152_s25, %s1145_s17 }
  0x26   : > { %p1149_p4 = pneg %p1148_p2  ;;  %p1155_p11 = por %p1154_p12, %p1153_p1 }
  0x28   : > { %p1156_p5 = pnand %p1155_p11, %p1149_p4 }
  0x2a   : > { %1159 = shalt.err (!%p1156_p5)
}
  0x2b   : > { %1066 = dma.hbm_to_vmem [thread:$0]  (!%p1354_p13), %s1350_s28, 128, %s1358_s30, %s118_s4  }
  0x2c   : > { %p1541_p9 = scmp.lt.s32.totalorder %s1256_s12, 3  ;;  %p1542_p0 = scmp.ge.s32.totalorder %s1256_s12, 1 }
  0x2d   : > { %s980_s27 = sshll.u32 %s1256_s12, 4  ;;  %s138_s7 = scalar_lea.vmem [#allocation5], %s1343_s23 }
  0x2e   : > { %p1391_p7 = pnand %p1542_p0, %p1541_p9  ;;  %s1399_s6 = scalar_lea.hbm %s1532_s1, %s980_s27 }
  0x2f   : > { %s145_s8 = sshll.u32 %s138_s7, 4  ;;  %s136_s14 = scalar_lea.sflag [#allocation6], %s1343_s23  ;;  %s146_s8 = int_to_ptr.vmem [resolvable:$true] %s145_s8 }
  0x30   : > { %s1543_s26 = scalar_select %p1391_p7, 1, 0 }
  0x31   : > { %s1160_s28 = scalar_lea.hbm %s1399_s6, 16  ;;  %s1165_s16 = scalar_lea.hbm %s1532_s1, 32 }
  0x32   : > { %p1161_p11 = scmp.ne.s32.totalorder %s1399_s6, %s1160_s28  ;;  %p1166_p8 = scmp.lt.s32.totalorder %s1399_s6, %s1532_s1 }
  0x33   : > { %p1167_p10 = scmp.lt.s32.totalorder %s1165_s16, %s1160_s28 }
  0x34   : > { %p1163_p12 = pnand %p1161_p11, %p1134_p3 }
  0x35   : > { %p1168_p2 = por %p1167_p10, %p1166_p8 }
  0x36   : > { %p1164_p1 = pneg %p1163_p12 }
  0x38   : > { %p1169_p4 = pnand %p1168_p2, %p1164_p1 }
  0x3a   : > { %1172 = shalt.err (!%p1169_p4)
}
  0x3b   : > { %s1173_s24 = scalar_lea.vmem %s146_s8, 16  ;;  %s1259_s23 = smov [#allocation5]  }
  0x3c   : > { %p1174_p5 = scmp.ne.s32.totalorder %s146_s8, %s1173_s24  ;;  %s1178_s25 = sshll.u32 %s1259_s23, 4  ;;  %s1179_s25 = int_to_ptr.vmem [resolvable:$false] %s1178_s25 }
  0x3d   : > { %s1180_s27 = scalar_lea.vmem %s1179_s25, 32  ;;  %p1181_p11 = scmp.lt.s32.totalorder %s146_s8, %s1179_s25 }
  0x3e   : > { %p1176_p9 = pnand %p1174_p5, %p1134_p3  ;;  %p1182_p12 = scmp.lt.s32.totalorder %s1180_s27, %s1173_s24 }
  0x40   : > { %p1177_p0 = pneg %p1176_p9  ;;  %p1183_p6 = por %p1182_p12, %p1181_p11 }
  0x42   : > { %p1184_p7 = pnand %p1183_p6, %p1177_p0 }
  0x44   : > { %1187 = shalt.err (!%p1184_p7)
}
  0x45   : > { %1069 = dma.hbm_to_vmem [thread:$0]  (!%p1354_p13), %s1399_s6, 16, %s146_s8, %s136_s14  }
  0x46   : > { %p1544_p1 = scmp.ne.s32.totalorder %s1543_s26, 0 }
  0x47   : > { %s1424_s29 = sand.u32 (!%p1544_p1), 1, %s1248_s10   ;;  %p1545_p6 = scmp.ne.s32.totalorder (!%p1544_p1), %s1537_s20, 0 }
  0x48   : > { %154 = sbr.rel (%p1544_p1) target bundleno = 1126 (0x466), region = 28  ;;  %s982_s5 = sshll.u32 (!%p1544_p1), %s1424_s29, 3 }
  0x49   : > { %s157_s7 = scalar_lea.sflag (!%p1544_p1), [#allocation3], %s1424_s29  ;;  %s160_s28 = scalar_lea.vmem (!%p1544_p1), [#allocation2], %s982_s5 }
  0x4d   : > { %1231 = dma.done.wait (%p1545_p6), %s157_s7, 128  }
  0x4e   : > { %1233 = vsyncadd (%p1545_p6), %s157_s7, 4294967168  ;;  %s166_s3 = scalar_lea.sflag [#allocation6], %s1424_s29  ;;  %s168_s26 = scalar_lea.vmem [#allocation5], %s1424_s29 }
  0x4f   : > { %1235 = dma.done.wait (%p1545_p6), %s166_s3, 16  }
  0x50   : > { %1237 = vsyncadd (%p1545_p6), %s166_s3, 4294967280  ;;  %v1260_v0 = vmov 0.0   ;;  %vm1261_vm0 = vmmov 0   ;;  %vm202_vm1 = vcmask 64512   ;;  %v193_v1 = vld [vmem:[%s160_s28] sm:$0xff]  ;;  %s1262_s20 = smov 120  }
  0x51   : > { %1017 = vmatprep.subr.mxu0 %v1260_v0  ;;  %1019 = vmatprep.mubr.msk.f32.mxu0 %vm1261_vm0, %v1260_v0  ;;  %v195_v2 = vmul.f32 0.35355338, %v193_v1  ;;  %s1263_s6 = smov 112   ;;  %s1264_s8 = smov 104   ;;  %v984_v3 = vld [vmem:[%s168_s26] ss:$0 sm:$0xff] }
  0x52   : > { %1022 = vmatprep.subr.mxu1 %v1260_v0  ;;  %1024 = vmatprep.mubr.msk.f32.mxu1 %vm1261_vm0, %v1260_v0  ;;  %s1265_s14 = smov 8   ;;  %s1266_s30 = smov 16   ;;  %vm865_vm2 = vcmask 130048   ;;  %vm867_vm3 = vcmask 195584   ;;  %vm869_vm4 = vcmask 261120  }
  0x53   : > { %1018 = vmatpush3.xpose.msk.msra.mxu0 %vm202_vm1, %v193_v1  ;;  %1023 = vmatpush3.msra.mxu1 %v193_v1  ;;  %s1267_s4 = smov 24   ;;  %s998_s16 = sshll.u32 %s1305_s13, 7 }
  0x54   : > { %1027 = vmatprep.subr.mxu1 %v1260_v0  ;;  %1032 = vmatprep.subr.mxu0 %v1260_v0  ;;  %s192_s17 = scalar_lea.vmem [#allocation7], %s982_s5  ;;  %s1494_s25 = scalar_lea.hbm %s1533_s2, %s998_s16 }
  0x55   : > { %363 = vrot.lane.b32.xlu1 %v195_v2, %s1262_s20  ;;  %s885_s19 = sshll.u32 %s192_s17, 4  ;;  %s872_s27 = scalar_lea.sflag [#allocation4], %s1424_s29  ;;  %s886_s19 = int_to_ptr.vmem [resolvable:$true] %s885_s19 }
  0x56   : > { %1020 = vmatmul.mubr.msk.f32.vlgmr.msra.gmra.mxu0 %vm202_vm1, %v195_v2  ;;  %s1188_s7 = scalar_lea.vmem %s886_s19, 128  ;;  %p1546_p3 = scmp.ne.s32.totalorder %s1538_s21, 0 }
  0x57   : > { %1034 = vmatprep.mubr.msk.f32.mxu0 %vm1261_vm0, %v1260_v0  ;;  %p1189_p13 = scmp.ne.s32.totalorder %s886_s19, %s1188_s7  ;;  %s1268_s13 = smov [#allocation7]  }
  0x58   : > { %s1192_s5 = sshll.u32 %s1268_s13, 4  ;;  %s1193_s5 = int_to_ptr.vmem [resolvable:$false] %s1192_s5 }
  0x59   : > { %528 = vrot.lane.b32.xlu1 %v193_v1, %s1263_s6  ;;  %p1190_p7 = pnand %p1189_p13, %p1546_p3  ;;  %s1194_s28 = scalar_lea.vmem %s1193_s5, 256 }
  0x5a   : > { %p1195_p10 = scmp.lt.s32.totalorder %s886_s19, %s1193_s5  ;;  %p1196_p2 = scmp.lt.s32.totalorder %s1194_s28, %s1188_s7 }
  0x5b   : > { %p1191_p8 = pneg %p1190_p7 }
  0x5c   : > { %p1197_p4 = por %p1196_p2, %p1195_p10 }
  0x5d   : > { %526 = vrot.lane.b32.xlu1 %v195_v2, %s1263_s6 }
  0x5e   : > { %p1198_p5 = pnand %p1197_p4, %p1191_p8 }
  0x61   : > { %691 = vrot.lane.b32.xlu1 %v193_v1, %s1264_s8 }
  0x65   : > { %689 = vrot.lane.b32.xlu1 %v195_v2, %s1264_s8 }
  0xc7   : > { %v364_v11 = vpop.permute.xlu1 %363 }
  0xcb   : > { %v529_v13 = vpop.permute.xlu1 %528 }
  0xcf   : > { %v527_v14 = vpop.permute.xlu1 %526 }
  0xd3   : > { %v692_v16 = vpop.permute.xlu1 %691 }
  0xd7   : > { %v690_v17 = vpop.permute.xlu1 %689 }
 0x116   : > { %v275_v4 = vpop.f32.mrf.mxu0 }
 0x117   : > { %v276_v5 = vadd.f32 %v984_v3, %v275_v4 }
 0x118   : > { %v1021_v6 = vpop.f32.mrf.mxu0 }
 0x119   : > { %v279_v7 = vsel %vm202_vm1, %v276_v5, -inf }
 0x11a   : > { %280 = vmax.xlane.f32.xlu0 %v279_v7 }
 0x130   : > { %365 = vrot.lane.b32.xlu0 %v193_v1, %s1262_s20 }
 0x1a3   : > { %v281_v8 = vpop.xlane.xlu0 %280 }
 0x1a4   : > { %v282_v9 = vsub.f32 %v276_v5, %v281_v8 }
 0x1a6   : > { %v283_v10 = vmul.f32 1.442695, %v282_v9 }
 0x1a7   : > { %v366_v12 = vpop.permute.xlu0 %365 }
 0x1a8   : > { %1116 = vpow2.f32 %v283_v10  ;;  %1033 = vmatpush3.msra.mxu0 %v366_v12 }
 0x1a9   : > { %1042 = vmatprep.subr.mxu0 %v1260_v0 }
 0x1b5   : > { %v1117_v15 = vpop.eup %1116 }
 0x1b6   : > { %1025 = vmatmul.mubr.msk.f32.vlgmr.msra.gmra.mxu1 %vm202_vm1, %v1117_v15  ;;  %v285_v46 = vsel %vm202_vm1, %v1117_v15, 0.0 }
 0x1b7   : > { %1028 = vmatpush3.xpose.msk.msra.mxu1 %vm202_vm1, %v366_v12  ;;  %1029 = vmatprep.mubr.msk.f32.mxu1 %vm1261_vm0, %v1260_v0 }
 0x1b8   : > { %1037 = vmatprep.subr.mxu1 %v1260_v0 }
 0x1ba   : > { %1030 = vmatmul.mubr.msk.f32.vlgmr.msra.gmra.mxu1 %vm202_vm1, %v364_v11 }
 0x1bb   : > { %1038 = vmatpush3.xpose.msk.msra.mxu1 %vm202_vm1, %v529_v13  ;;  %1039 = vmatprep.mubr.msk.f32.mxu1 %vm1261_vm0, %v1260_v0 }
 0x1bc   : > { %1047 = vmatprep.subr.mxu1 %v1260_v0 }
 0x1be   : > { %1040 = vmatmul.mubr.msk.f32.vlgmr.msra.gmra.mxu1 %vm202_vm1, %v527_v14 }
 0x1bf   : > { %1048 = vmatpush3.xpose.msk.msra.mxu1 %vm202_vm1, %v692_v16  ;;  %1049 = vmatprep.mubr.msk.f32.mxu1 %vm1261_vm0, %v1260_v0 }
 0x1c2   : > { %1050 = vmatmul.mubr.msk.f32.vlgmr.msra.gmra.mxu1 %vm202_vm1, %v690_v17 }
 0x276   : > { %v1469_v18 = vpop.f32.mrf.mxu1 }
 0x278   : > { %v1026_v19 = vpop.f32.mrf.mxu1 }
 0x27a   : > { %v437_v20 = vpop.f32.mrf.mxu1 }
 0x27b   : > { %v438_v21 = vadd.f32 %v984_v3, %v437_v20 }
 0x27c   : > { %v1031_v22 = vpop.f32.mrf.mxu1 }
 0x27d   : > { %v441_v23 = vsel %vm202_vm1, %v438_v21, -inf }
 0x27e   : > { %442 = vmax.xlane.f32.xlu1 %v441_v23  ;;  %v600_v24 = vpop.f32.mrf.mxu1 }
 0x27f   : > { %v601_v25 = vadd.f32 %v984_v3, %v600_v24 }
 0x280   : > { %v1041_v26 = vpop.f32.mrf.mxu1 }
 0x281   : > { %v604_v27 = vsel %vm202_vm1, %v601_v25, -inf }
 0x282   : > { %605 = vmax.xlane.f32.xlu0 %v604_v27  ;;  %v763_v28 = vpop.f32.mrf.mxu1 }
 0x283   : > { %v764_v29 = vadd.f32 %v984_v3, %v763_v28 }
 0x284   : > { %v1051_v30 = vpop.f32.mrf.mxu1 }
 0x285   : > { %v767_v31 = vsel %vm202_vm1, %v764_v29, -inf }
 0x286   : > { %768 = vmax.xlane.f32.xlu1 %v767_v31 }
 0x307   : > { %v443_v32 = vpop.xlane.xlu1 %442 }
 0x308   : > { %v444_v33 = vsub.f32 %v438_v21, %v443_v32 }
 0x30a   : > { %v445_v34 = vmul.f32 1.442695, %v444_v33 }
 0x30b   : > { %v606_v35 = vpop.xlane.xlu0 %605 }
 0x30c   : > { %1118 = vpow2.f32 %v445_v34  ;;  %v607_v36 = vsub.f32 %v601_v25, %v606_v35 }
 0x30e   : > { %v608_v37 = vmul.f32 1.442695, %v607_v36 }
 0x30f   : > { %v769_v38 = vpop.xlane.xlu1 %768 }
 0x310   : > { %1120 = vpow2.f32 %v608_v37  ;;  %v770_v39 = vsub.f32 %v764_v29, %v769_v38 }
 0x312   : > { %v771_v40 = vmul.f32 1.442695, %v770_v39 }
 0x314   : > { %1122 = vpow2.f32 %v771_v40 }
 0x319   : > { %v1119_v41 = vpop.eup %1118 }
 0x31a   : > { %1035 = vmatmul.mubr.msk.f32.vlgmr.msra.gmra.mxu0 %vm202_vm1, %v1119_v41  ;;  %v447_v42 = vsel %vm202_vm1, %v1119_v41, 0.0 }
 0x31b   : > { %1043 = vmatpush3.msra.mxu0 %v529_v13  ;;  %448 = vadd.xlane.f32.xlu0 %v447_v42 }
 0x31c   : > { %1044 = vmatprep.mubr.msk.f32.mxu0 %vm1261_vm0, %v1260_v0  ;;  %1052 = vmatprep.subr.mxu0 %v1260_v0 }
 0x31d   : > { %v1121_v43 = vpop.eup %1120 }
 0x31e   : > { %1045 = vmatmul.mubr.msk.f32.vlgmr.msra.gmra.mxu0 %vm202_vm1, %v1121_v43  ;;  %v610_v44 = vsel %vm202_vm1, %v1121_v43, 0.0 }
 0x31f   : > { %1053 = vmatpush3.msra.mxu0 %v692_v16  ;;  %611 = vadd.xlane.f32.xlu1 %v610_v44 }
 0x320   : > { %1054 = vmatprep.mubr.msk.f32.mxu0 %vm1261_vm0, %v1260_v0 }
 0x321   : > { %v1123_v45 = vpop.eup %1122 }
 0x322   : > { %1055 = vmatmul.mubr.msk.f32.vlgmr.msra.gmra.mxu0 %vm202_vm1, %v1123_v45  ;;  %v773_v47 = vsel %vm202_vm1, %v1123_v45, 0.0 }
 0x323   : > { %286 = vadd.xlane.f32.xlu1 %v285_v46  ;;  %774 = vadd.xlane.f32.xlu0 %v773_v47 }
 0x3a4   : > { %v449_v48 = vpop.xlane.xlu0 %448 }
 0x3a5   : > { %1124 = vrcp.f32 %v449_v48 }
 0x3a8   : > { %v612_v49 = vpop.xlane.xlu1 %611 }
 0x3a9   : > { %1126 = vrcp.f32 %v612_v49 }
 0x3ac   : > { %v775_v50 = vpop.xlane.xlu0 %774  ;;  %v287_v63 = vpop.xlane.xlu1 %286 }
 0x3ad   : > { %1128 = vrcp.f32 %v775_v50 }
 0x3ae   : > { %1130 = vrcp.f32 %v287_v63 }
 0x3b2   : > { %v1125_v51 = vpop.eup %1124 }
 0x3b6   : > { %v1127_v55 = vpop.eup %1126 }
 0x3ba   : > { %v1129_v59 = vpop.eup %1128 }
 0x3bb   : > { %v1131_v0 = vpop.eup %1130 }
 0x3bc   : > { %v362_v3 = vmul.f32 %v1131_v0, %v1469_v18 }
 0x3da   : > { %v520_v52 = vpop.f32.mrf.mxu0 }
 0x3db   : > { %v525_v53 = vmul.f32 %v1125_v51, %v520_v52 }
 0x3dc   : > { %v1036_v54 = vpop.f32.mrf.mxu0 }
 0x3dd   : > { %853 = vrot.lane.b32.xlu0 %v525_v53, %s1265_s14 }
 0x3de   : > { %v683_v56 = vpop.f32.mrf.mxu0 }
 0x3df   : > { %v688_v57 = vmul.f32 %v1127_v55, %v683_v56 }
 0x3e0   : > { %v1046_v58 = vpop.f32.mrf.mxu0 }
 0x3e1   : > { %857 = vrot.lane.b32.xlu1 %v688_v57, %s1266_s30 }
 0x3e2   : > { %v846_v60 = vpop.f32.mrf.mxu0 }
 0x3e3   : > { %v851_v61 = vmul.f32 %v1129_v59, %v846_v60 }
 0x3e4   : > { %v1056_v62 = vpop.f32.mrf.mxu0 }
 0x3e5   : > { %861 = vrot.lane.b32.xlu1 %v851_v61, %s1267_s4 }
 0x44f   : > { %v854_v1 = vpop.permute.xlu0 %853 }
 0x450   : > { %v864_v4 = vsel %vm202_vm1, %v362_v3, %v854_v1 }
 0x453   : > { %v858_v2 = vpop.permute.xlu1 %857 }
 0x454   : > { %v866_v5 = vsel %vm865_vm2, %v864_v4, %v858_v2 }
 0x457   : > { %v862_v6 = vpop.permute.xlu1 %861 }
 0x458   : > { %v868_v7 = vsel %vm867_vm3, %v866_v5, %v862_v6 }
 0x459   : > { %870 = vst.msk [vmem:[%s192_s17] sm:$0xff] %vm869_vm4, %v868_v7 }
 0x45a   : > { %1201 = shalt.err (!%p1198_p5)
}
 0x45b   : > { %s1202_s3 = scalar_lea.hbm %s1494_s25, 128  ;;  %s1206_s20 = scalar_lea.hbm %s1533_s2, 256 }
 0x45c   : > { %p1203_p9 = scmp.ne.s32.totalorder %s1494_s25, %s1202_s3  ;;  %p1207_p12 = scmp.lt.s32.totalorder %s1494_s25, %s1533_s2 }
 0x45d   : > { %p1208_p1 = scmp.lt.s32.totalorder %s1206_s20, %s1202_s3 }
 0x45e   : > { %p1204_p0 = pnand %p1203_p9, %p1546_p3 }
 0x45f   : > { %p1209_p6 = por %p1208_p1, %p1207_p12 }
 0x460   : > { %p1205_p11 = pneg %p1204_p0 }
 0x462   : > { %p1210_p13 = pnand %p1209_p6, %p1205_p11 }
 0x464   : > { %1213 = shalt.err (!%p1210_p13)
}
 0x465   : > { %1061 = dma.vmem_to_hbm [thread:$0]  (%p1546_p3), %s886_s19, 128, %s1494_s25, %s872_s27  }
 0x466 PF: > { %s897_s14 = sand.u32 1, %s1244_s9   ;;  %p1547_p7 = scmp.ne.s32.totalorder %s1539_s22, 0 }
 0x467   : > { %p1548_p8 = scmp.ge.s32.totalorder %s1256_s12, 2  ;;  %s898_s30 = scalar_lea.sflag [#allocation4], %s897_s14 }
 0x469   : > { %p1071_p10 = pnand %p1548_p8, %p1547_p7 }
 0x46b   : > { %p1072_p2 = pneg %p1071_p10 }
 0x46d   : > { %1239 = dma.done.wait (%p1072_p2), %s898_s30, 128  }
 0x46e   : > { %1241 = vsyncadd (%p1072_p2), %s898_s30, 4294967168  ;;  %p18_p4 = scmp.ge.s32.totalorder %s1309_s15, 4   ;;  %s1549_s9 = smov %s1248_s10 }
 0x46f   : > { %s1550_s10 = smov %s1252_s11  ;;  %s1551_s11 = smov %s1321_s18 }
 0x470   : > { %s1552_s12 = smov %s1309_s15  ;;  %20 = sbr.rel (!%p18_p4) target bundleno = 7 (0x7), region = 86 }
 0x475   :  { %903 = vsyncpa [#allocation3], 1 }
 0x476   :  { %905 = vsyncpa [#allocation3 + $0x1], 1 }
 0x477   :  { %906 = vsyncpa [#allocation6], 1 }
 0x478   :  { %908 = vsyncpa [#allocation6 + $0x1], 1 }
 0x479   :  { %909 = vsyncpa [#allocation4], 1 }
 0x47a   :  { %911 = vsyncpa [#allocation4 + $0x1], 1 }

</bundles_post_ra>
